<compile_context>
chip_gen: v7x
topology: tpu7x:2x2x1
jax: 0.10.0
libtpu: 0.0.40
codegen_flags: <defaults>
</compile_context>

<pallas_src>
import functools
import math

import jax
import jax.numpy as jnp
from jax.experimental import pallas as pl
from jax.experimental.pallas import tpu as pltpu

_SQRT2_INV = 1.0 / math.sqrt(2.0)


def _round_up(v, m):
    return ((v + m - 1) // m) * m


def _head_transform_kernel(x_ref, w_ref, b_ref, g_ref, beta_ref, o_ref,
                           *, eps, h_real, mxu_dtype):
    # x_ref:    (TM, H_pad)    input rows
    # w_ref:    (H_pad, H_pad) dense weight, (in, out) layout, zero-padded
    # b_ref:    (1, H_pad)     dense bias (f32, zero-padded)
    # g_ref:    (1, H_pad)     LayerNorm gamma (f32, zero-padded)
    # beta_ref: (1, H_pad)     LayerNorm beta (f32, zero-padded)
    # o_ref:    (TM, H_pad)    output tile
    x = x_ref[...]
    w = w_ref[...]
    if mxu_dtype is not None:
        x = x.astype(mxu_dtype)
        w = w.astype(mxu_dtype)

    # MXU matmul with f32 accumulation.
    h = jnp.dot(x, w, preferred_element_type=jnp.float32)
    h = h + b_ref[...]

    # erf-based GELU (matches torch.erf gelu exactly). gelu(0) == 0, so padded
    # lanes (zero weight columns + zero bias) stay exactly zero.
    h = h * 0.5 * (1.0 + jax.lax.erf(h * _SQRT2_INV))

    # One-pass LayerNorm statistics over the real hidden width.  Padded lanes
    # of h are exactly zero, so sums over H_pad equal sums over the real H.
    inv_h = 1.0 / h_real
    s1 = jnp.sum(h, axis=-1, keepdims=True)
    s2 = jnp.sum(h * h, axis=-1, keepdims=True)
    mean = s1 * inv_h
    var = jnp.maximum(s2 * inv_h - mean * mean, 0.0)   # clamp: f32 cancellation
    inv = jax.lax.rsqrt(var + eps)
    # Padded rows (if any) produce finite garbage and are sliced off by the
    # wrapper; padded lanes end up 0 because gamma/beta are zero there.
    o_ref[...] = ((h - mean) * inv * g_ref[...] + beta_ref[...]).astype(o_ref.dtype)


def _resident_spec(shape):
    """BlockSpec for a grid-invariant operand; single-buffered when supported."""
    idx = lambda i: (0,) * len(shape)
    if hasattr(pl, "Buffered"):
        try:
            return pl.BlockSpec(shape, idx, pipeline_mode=pl.Buffered(1))
        except TypeError:  # older jax without pipeline_mode kwarg
            pass
    return pl.BlockSpec(shape, idx)


def prepare_params(weight, bias, gamma, beta, *, param_dtype=None):
    """One-time parameter prep, hoisted out of the per-forward path.

    weight: (H, H) in PyTorch nn.Linear (out, in) layout.
    Returns (w_p, b_p, g_p, beta_p) with the hidden axis padded to a multiple
    of 128 lanes, weight transposed to (in, out), padding zero-filled.
    """
    H = weight.shape[0]
    H_pad = _round_up(H, 128)
    wdt = param_dtype if param_dtype is not None else weight.dtype
    w_p = jnp.zeros((H_pad, H_pad), wdt).at[:H, :H].set(weight.T.astype(wdt))
    b_p = jnp.zeros((1, H_pad), jnp.float32).at[:, :H].set(bias.astype(jnp.float32))
    g_p = jnp.zeros((1, H_pad), jnp.float32).at[:, :H].set(gamma.astype(jnp.float32))
    bt_p = jnp.zeros((1, H_pad), jnp.float32).at[:, :H].set(beta.astype(jnp.float32))
    return w_p, b_p, g_p, bt_p


def visual_prediction_head_transform(x, params, eps, *, tm=256, mxu_dtype=None):
    """x: (B, S, H).  params: output of prepare_params().  eps: LayerNorm eps.

    mxu_dtype: optional matmul-operand dtype (e.g. jnp.bfloat16) for MXU speed;
    None keeps native-precision matmul (exact parity with fp32 torch).
    """
    B, S, H = x.shape
    w_p, b_p, g_p, bt_p = params
    H_pad = w_p.shape[0]
    M = B * S

    # Row tile: <= tm, 8-aligned, and small enough that >= 2 tiles exist when
    # possible so the "parallel" row axis can split across v7x's two TCs.
    TM = max(8, min(tm, _round_up((M + 1) // 2, 8)))
    M_pad = _round_up(M, TM)
    n_tiles = M_pad // TM

    x2d = x.reshape(M, H)
    if M_pad == M and H_pad == H:
        x_in = x2d                                    # fast path: no pad copy
    else:
        x_in = jnp.zeros((M_pad, H_pad), x.dtype).at[:M, :H].set(x2d)

    kernel = functools.partial(
        _head_transform_kernel, eps=float(eps), h_real=H, mxu_dtype=mxu_dtype)

    out2d = pl.pallas_call(
        kernel,
        out_shape=jax.ShapeDtypeStruct((M_pad, H_pad), x.dtype),
        grid_spec=pltpu.PrefetchScalarGridSpec(
            num_scalar_prefetch=0,
            grid=(n_tiles,),
            in_specs=[
                pl.BlockSpec((TM, H_pad), lambda i: (i, 0)),   # x tile (pipelined)
                _resident_spec((H_pad, H_pad)),                # weight, resident
                _resident_spec((1, H_pad)),                    # bias
                _resident_spec((1, H_pad)),                    # gamma
                _resident_spec((1, H_pad)),                    # beta
            ],
            out_specs=pl.BlockSpec((TM, H_pad), lambda i: (i, 0)),
        ),
        compiler_params=pltpu.CompilerParams(
            dimension_semantics=("parallel",),   # independent row tiles
        ),
    )(x_in, w_p, b_p, g_p, bt_p)

    if M_pad != M or H_pad != H:
        out2d = out2d[:M, :H]
    return out2d.reshape(B, S, H)


def _reference(x, weight, bias, gamma, beta, eps):
    h = jnp.einsum("bsh,oh->bso", x, weight) + bias
    h = h * 0.5 * (1.0 + jax.lax.erf(h / math.sqrt(2.0)))
    mean = jnp.mean(h, axis=-1, keepdims=True)
    var = jnp.mean((h - mean) ** 2, axis=-1, keepdims=True)
    return (h - mean) / jnp.sqrt(var + eps) * gamma + beta


if __name__ == "__main__":
    # Small config: batch=2, seq=8, hidden=32, gelu activation, eps=1e-12
    B, S, H = 2, 8, 32
    eps = 1e-12

    key = jax.random.PRNGKey(0)
    kx, kw, kb, kg, kbeta = jax.random.split(key, 5)

    x = jax.random.normal(kx, (B, S, H), dtype=jnp.float32)
    # Deterministic synthetic "init" of module parameters.
    weight = jax.random.normal(kw, (H, H), dtype=jnp.float32) * (1.0 / math.sqrt(H))
    bias = jax.random.normal(kb, (H,), dtype=jnp.float32) * 0.01
    gamma = 1.0 + 0.05 * jax.random.normal(kg, (H,), dtype=jnp.float32)
    beta = 0.05 * jax.random.normal(kbeta, (H,), dtype=jnp.float32)

    # One-time parameter prep (transpose + lane padding), hoisted out of forward.
    params = prepare_params(weight, bias, gamma, beta)

    out = visual_prediction_head_transform(x, params, eps)
    out = jax.block_until_ready(out)

    ref = _reference(x, weight, bias, gamma, beta, eps)
    assert out.shape == (B, S, H)
    assert jnp.allclose(out, ref, atol=1e-5, rtol=1e-5), (
        f"max abs err {jnp.max(jnp.abs(out - ref))}"
    )

    print("KERNEL_OK")
</pallas_src>

<mosaic_0001>
module attributes {stable_mosaic.version = 11 : i64} {
  func.func @_head_transform_kernel(%arg0: i32, %arg1: memref<8x128xf32, #tpu.memory_space<vmem>>, %arg2: memref<128x128xf32, #tpu.memory_space<vmem>>, %arg3: memref<1x128xf32, #tpu.memory_space<vmem>>, %arg4: memref<1x128xf32, #tpu.memory_space<vmem>>, %arg5: memref<1x128xf32, #tpu.memory_space<vmem>>, %arg6: memref<8x128xf32, #tpu.memory_space<vmem>>) attributes {dimension_semantics = [#tpu.dimension_semantics<parallel>], iteration_bounds = array<i64: 2>, scalar_prefetch = 0 : i64, scratch_operands = 0 : i64, tpu.core_type = #tpu.core_type<tc>, window_params = [{transform_indices = @transform_0, window_bounds = array<i64: 8, 128>}, {pipeline_mode = #tpu.pipeline_mode<synchronous>, transform_indices = @transform_1, window_bounds = array<i64: 128, 128>}, {pipeline_mode = #tpu.pipeline_mode<synchronous>, transform_indices = @transform_2, window_bounds = array<i64: 1, 128>}, {pipeline_mode = #tpu.pipeline_mode<synchronous>, transform_indices = @transform_3, window_bounds = array<i64: 1, 128>}, {pipeline_mode = #tpu.pipeline_mode<synchronous>, transform_indices = @transform_4, window_bounds = array<i64: 1, 128>}, {transform_indices = @transform_5, window_bounds = array<i64: 8, 128>}]} {
    %c0 = arith.constant 0 : index
    %c0_0 = arith.constant 0 : index
    %0 = vector.load %arg1[%c0, %c0_0] : memref<8x128xf32, #tpu.memory_space<vmem>>, vector<8x128xf32>
    %c0_1 = arith.constant 0 : index
    %c0_2 = arith.constant 0 : index
    %1 = vector.load %arg2[%c0_1, %c0_2] : memref<128x128xf32, #tpu.memory_space<vmem>>, vector<128x128xf32>
    %cst = arith.constant dense<0.000000e+00> : vector<8x128xf32>
    %2 = tpu.matmul %0, %1, %cst {dimension_numbers = #tpu.dot_dimension_numbers<[1], [0], [0], [1], [0, 0, 1, 1], [], []>} : vector<8x128xf32>, vector<128x128xf32>, vector<8x128xf32> -> vector<8x128xf32>
    %c0_3 = arith.constant 0 : index
    %c0_4 = arith.constant 0 : index
    %3 = vector.load %arg3[%c0_3, %c0_4] : memref<1x128xf32, #tpu.memory_space<vmem>>, vector<1x128xf32>
    %4 = vector.broadcast %3 : vector<1x128xf32> to vector<8x128xf32>
    %5 = arith.addf %2, %4 : vector<8x128xf32>
    %cst_5 = arith.constant 5.000000e-01 : f32
    %6 = vector.broadcast %cst_5 : f32 to vector<8x128xf32>
    %7 = arith.mulf %5, %6 : vector<8x128xf32>
    %cst_6 = arith.constant 0.707106769 : f32
    %8 = vector.broadcast %cst_6 : f32 to vector<8x128xf32>
    %9 = arith.mulf %5, %8 : vector<8x128xf32>
    %10 = math.erf %9 : vector<8x128xf32>
    %cst_7 = arith.constant 1.000000e+00 : f32
    %11 = vector.broadcast %cst_7 : f32 to vector<8x128xf32>
    %12 = arith.addf %11, %10 : vector<8x128xf32>
    %13 = arith.mulf %7, %12 : vector<8x128xf32>
    %cst_8 = arith.constant dense<0.000000e+00> : vector<8xf32>
    %14 = vector.multi_reduction <add>, %13, %cst_8 [1] : vector<8x128xf32> to vector<8xf32>
    %15 = vector.shape_cast %14 : vector<8xf32> to vector<8x1xf32>
    %16 = arith.mulf %13, %13 : vector<8x128xf32>
    %cst_9 = arith.constant dense<0.000000e+00> : vector<8xf32>
    %17 = vector.multi_reduction <add>, %16, %cst_9 [1] : vector<8x128xf32> to vector<8xf32>
    %18 = vector.shape_cast %17 : vector<8xf32> to vector<8x1xf32>
    %cst_10 = arith.constant 3.125000e-02 : f32
    %19 = vector.broadcast %cst_10 : f32 to vector<8x1xf32>
    %20 = arith.mulf %15, %19 : vector<8x1xf32>
    %cst_11 = arith.constant 3.125000e-02 : f32
    %21 = vector.broadcast %cst_11 : f32 to vector<8x1xf32>
    %22 = arith.mulf %18, %21 : vector<8x1xf32>
    %23 = arith.mulf %20, %20 : vector<8x1xf32>
    %24 = arith.subf %22, %23 : vector<8x1xf32>
    %cst_12 = arith.constant 0.000000e+00 : f32
    %25 = vector.broadcast %cst_12 : f32 to vector<8x1xf32>
    %26 = arith.maximumf %24, %25 : vector<8x1xf32>
    %cst_13 = arith.constant 9.99999996E-13 : f32
    %27 = vector.broadcast %cst_13 : f32 to vector<8x1xf32>
    %28 = arith.addf %26, %27 : vector<8x1xf32>
    %29 = math.rsqrt %28 : vector<8x1xf32>
    %30 = vector.broadcast %20 : vector<8x1xf32> to vector<8x128xf32>
    %31 = arith.subf %13, %30 : vector<8x128xf32>
    %32 = vector.broadcast %29 : vector<8x1xf32> to vector<8x128xf32>
    %33 = arith.mulf %31, %32 : vector<8x128xf32>
    %c0_14 = arith.constant 0 : index
    %c0_15 = arith.constant 0 : index
    %34 = vector.load %arg4[%c0_14, %c0_15] : memref<1x128xf32, #tpu.memory_space<vmem>>, vector<1x128xf32>
    %35 = vector.broadcast %34 : vector<1x128xf32> to vector<8x128xf32>
    %36 = arith.mulf %33, %35 : vector<8x128xf32>
    %c0_16 = arith.constant 0 : index
    %c0_17 = arith.constant 0 : index
    %37 = vector.load %arg5[%c0_16, %c0_17] : memref<1x128xf32, #tpu.memory_space<vmem>>, vector<1x128xf32>
    %38 = vector.broadcast %37 : vector<1x128xf32> to vector<8x128xf32>
    %39 = arith.addf %36, %38 : vector<8x128xf32>
    %c0_18 = arith.constant 0 : index
    %c0_19 = arith.constant 0 : index
    %40 = vector.load %arg6[%c0_18, %c0_19] : memref<8x128xf32, #tpu.memory_space<vmem>>, vector<8x128xf32>
    tpu.vector_store %arg6[%c0_18, %c0_19], %39 {strides = array<i32>} : memref<8x128xf32, #tpu.memory_space<vmem>>, vector<8x128xf32>,
    return
  }
  func.func @transform_0(%arg0: i32) -> (i32, i32) {
    %c0_i32 = arith.constant 0 : i32
    %c0_i32_0 = arith.constant 0 : i32
    return %arg0, %c0_i32 : i32, i32
  }
  func.func @transform_1(%arg0: i32) -> (i32, i32) {
    %c0_i32 = arith.constant 0 : i32
    %c0_i32_0 = arith.constant 0 : i32
    %c0_i32_1 = arith.constant 0 : i32
    return %c0_i32, %c0_i32_0 : i32, i32
  }
  func.func @transform_2(%arg0: i32) -> (i32, i32) {
    %c0_i32 = arith.constant 0 : i32
    %c0_i32_0 = arith.constant 0 : i32
    %c0_i32_1 = arith.constant 0 : i32
    return %c0_i32, %c0_i32_0 : i32, i32
  }
  func.func @transform_3(%arg0: i32) -> (i32, i32) {
    %c0_i32 = arith.constant 0 : i32
    %c0_i32_0 = arith.constant 0 : i32
    %c0_i32_1 = arith.constant 0 : i32
    return %c0_i32, %c0_i32_0 : i32, i32
  }
  func.func @transform_4(%arg0: i32) -> (i32, i32) {
    %c0_i32 = arith.constant 0 : i32
    %c0_i32_0 = arith.constant 0 : i32
    %c0_i32_1 = arith.constant 0 : i32
    return %c0_i32, %c0_i32_0 : i32, i32
  }
  func.func @transform_5(%arg0: i32) -> (i32, i32) {
    %c0_i32 = arith.constant 0 : i32
    %c0_i32_0 = arith.constant 0 : i32
    return %arg0, %c0_i32 : i32, i32
  }
}

</mosaic_0001>

<bundles_post_ra>
// kernel: tpu_custom_call.1
= control target key start
LH: loop header
LB: loop body
LE: loop exit
PB: predicated region body
PF: predicated region fallthrough
CT: control target
= control target key end

     0   :  { %10 = vsyncpa [#allocation3], 0  ;;  %s1018_s0 = inlined_call_operand.hbm [shape: f32[16,128], index: 0, kind: input, shape index: {}]   ;;  %s1019_s1 = inlined_call_operand.hbm [shape: f32[128,128], index: 1, kind: input, shape index: {}]   ;;  %s1020_s2 = inlined_call_operand.vmem [shape: f32[1,128], index: 2, kind: input, shape index: {}]   ;;  %s1021_s3 = inlined_call_operand.vmem [shape: f32[1,128], index: 3, kind: input, shape index: {}]   ;;  %s1022_s4 = inlined_call_operand.vmem [shape: f32[1,128], index: 4, kind: input, shape index: {}]   ;;  %s1023_s5 = inlined_call_operand.hbm [shape: f32[16,128], index: 5, kind: output, shape index: {}]  }
   0x1   :  { %12 = vsyncpa [#allocation3 + $0x1], 0 }
   0x2   :  { %13 = vsyncpa [#allocation6], 0 }
   0x3   :  { %14 = vsyncpa [#allocation4], 0 }
   0x4   :  { %16 = vsyncpa [#allocation4 + $0x1], 0  ;;  %s806_s18 = smov 0   ;;  %s808_s19 = smov 0  }
   0x5   :  { %s810_s20 = smov 0   ;;  %s812_s21 = smov 0  }
   0x6 LB: > { %s827_s22 = sadd.s32 4294967295, %s766_s21   ;;  %s479_s23 = sadd.s32 4294967294, %s766_s21   ;;  %s766_s21 = sphi %s812_s21, %s1043_s21   ;;  %s762_s20 = sphi %s810_s20, %s1042_s20   ;;  %s758_s19 = sphi %s808_s19, %s1041_s19   ;;  %s754_s18 = sphi %s806_s18, %s1040_s18  }
   0x7   : > { %p42_p0 = scmp.ne.s32.totalorder %s758_s19, %s754_s18  ;;  %p1024_p1 = scmp.eq.s32.totalorder %s827_s22, 0 }
   0x8   : > { %p156_p3 = scmp.eq.s32.totalorder %s479_s23, 1  ;;  %p480_p5 = scmp.ge.s32.totalorder %s766_s21, 1 }
   0x9   : > { %p836_p4 = por %p1024_p1, %p42_p0  ;;  %p163_p7 = scmp.lt.s32.totalorder %s766_s21, 3 }
   0xa   : > { %p841_p6 = por %p156_p3, %p42_p0  ;;  %s768_s27 = smov [#allocation5]  }
   0xb   : > { %s1027_s24 = scalar_select %p836_p4, 1, 0 }
   0xc   : > { %s1028_s25 = scalar_select %p841_p6, 1, 0 }
   0xd   : > { %p846_p8 = pnand %p480_p5, %p163_p7  ;;  %s175_s28 = sshll.u32 %s768_s27, 4  ;;  %s850_s28 = int_to_ptr.vmem [resolvable:$true] %s175_s28 }
   0xe   : > { %s862_s30 = sadd.s32 1, %s766_s21   ;;  %s29_s6 = sadd.s32 1, %s762_s20 }
   0xf   : > { %s1029_s26 = scalar_select %p846_p8, 1, 0 }
  0x10   : > { %p580_p9 = pneg %p846_p8  ;;  %s26_s7 = ssub.s32 %s766_s21, %s862_s30 }
  0x11   : > { %s638_s10 = scalar_lea.hbm %s1019_s1, 2048 }
  0x12   : > { %p857_p11 = pnand %p580_p9, %p1024_p1  ;;  %p639_p12 = scmp.ne.s32.totalorder %s1019_s1, %s638_s10 }
  0x13   : > { %p645_p5 = scmp.lt.u32.totalorder %s638_s10, %s1019_s1 }
  0x14   : > { %p640_p13 = pneg %p857_p11 }
  0x16   : > { %p641_p0 = pnand %p640_p13, %p639_p12 }
  0x18   : > { %p642_p3 = pneg %p641_p0 }
  0x1a   : > { %p647_p7 = pnand %p645_p5, %p642_p3 }
  0x1c   : > { %650 = shalt.err (!%p647_p7)
}
  0x1d   : > { %s651_s15 = scalar_lea.vmem %s850_s28, 2048  ;;  %p659_p2 = scmp.lt.s32.totalorder %s850_s28, %s850_s28 }
  0x1e   : > { %p652_p9 = scmp.ne.s32.totalorder %s850_s28, %s651_s15  ;;  %p660_p6 = scmp.lt.s32.totalorder %s651_s15, %s651_s15 }
  0x20   : > { %p654_p10 = pnand %p652_p9, %p640_p13  ;;  %p661_p4 = por %p660_p6, %p659_p2 }
  0x22   : > { %p655_p1 = pneg %p654_p10 }
  0x24   : > { %p662_p8 = pnand %p661_p4, %p655_p1 }
  0x26   : > { %665 = shalt.err (!%p662_p8)
}
  0x27   : > { %s769_s16 = smov 128   ;;  %s770_s17 = smov 8  }
  0x28   : > { %583 = dma.hbm_to_vmem [thread:$0]  (!%p857_p11), %s1019_s1, 2048, %s850_s28, [#allocation6], %s769_s16, %s769_s16, %s770_s17  }
  0x29   : > { %p27_p2 = scmp.eq.s32.totalorder %s26_s7, 0  ;;  %p36_p1 = scmp.ne.s32.totalorder %s762_s20, %s758_s19 }
  0x2a   : > { %p37_p4 = scmp.eq.s32.totalorder %s766_s21, 0  ;;  %p593_p6 = scmp.lt.s32.totalorder %s766_s21, 2 }
  0x2b   : > { %s893_s8 = scalar_select %p27_p2, %s762_s20, %s29_s6  }
  0x2c   : > { %p38_p8 = por %p37_p4, %p36_p1  ;;  %p1031_p10 = scmp.eq.s32.totalorder %s827_s22, 1 }
  0x2d   : > { %s198_s10 = sand.u32 1, %s762_s20   ;;  %s484_s11 = sshll.u32 %s766_s21, 7 }
  0x2e   : > { %p897_p12 = por %p1031_p10, %p36_p1  ;;  %s483_s12 = sshll.u32 %s198_s10, 3 }
  0x2f   : > { %s906_s14 = scalar_lea.hbm %s1018_s0, %s484_s11  ;;  %s202_s28 = scalar_lea.vmem [#allocation2], %s483_s12 }
  0x30   : > { %s209_s6 = sshll.u32 %s202_s28, 4  ;;  %p908_p11 = pnand %p593_p6, %p38_p8  ;;  %s912_s6 = int_to_ptr.vmem [resolvable:$true] %s209_s6 }
  0x31   : > { %s199_s15 = scalar_lea.sflag [#allocation3], %s198_s10  ;;  %s666_s16 = scalar_lea.hbm %s906_s14, 128 }
  0x32   : > { %p667_p13 = scmp.ne.s32.totalorder %s906_s14, %s666_s16  ;;  %p668_p0 = pneg %p908_p11 }
  0x33   : > { %s671_s27 = scalar_lea.hbm %s1018_s0, 256  ;;  %p672_p7 = scmp.lt.u32.totalorder %s906_s14, %s1018_s0 }
  0x34   : > { %p669_p3 = pnand %p668_p0, %p667_p13  ;;  %p673_p9 = scmp.lt.u32.totalorder %s671_s27, %s666_s16 }
  0x35   : > { %p675_p1 = scmp.lt.u32.totalorder %s666_s16, %s906_s14 }
  0x36   : > { %p670_p5 = pneg %p669_p3  ;;  %p674_p2 = por %p673_p9, %p672_p7 }
  0x38   : > { %p676_p4 = por %p675_p1, %p674_p2 }
  0x3a   : > { %p677_p6 = pnand %p676_p4, %p670_p5 }
  0x3c   : > { %680 = shalt.err (!%p677_p6)
}
  0x3d   : > { %s681_s10 = scalar_lea.vmem %s912_s6, 128  ;;  %s771_s29 = smov [#allocation2]  }
  0x3e   : > { %p682_p8 = scmp.ne.s32.totalorder %s912_s6, %s681_s10  ;;  %s686_s13 = sshll.u32 %s771_s29, 4  ;;  %s687_s13 = int_to_ptr.vmem [resolvable:$false] %s686_s13 }
  0x3f   : > { %s688_s28 = scalar_lea.vmem %s687_s13, 256  ;;  %p689_p3 = scmp.lt.s32.totalorder %s912_s6, %s687_s13 }
  0x40   : > { %p684_p10 = pnand %p682_p8, %p668_p0  ;;  %p690_p7 = scmp.lt.s32.totalorder %s688_s28, %s681_s10 }
  0x42   : > { %p685_p13 = pneg %p684_p10  ;;  %p691_p9 = por %p690_p7, %p689_p3 }
  0x44   : > { %p692_p2 = pnand %p691_p9, %p685_p13 }
  0x46   : > { %695 = shalt.err (!%p692_p2)
}
  0x47   : > { %587 = dma.hbm_to_vmem [thread:$0]  (!%p908_p11), %s906_s14, 128, %s912_s6, %s199_s15  }
  0x48   : > { %p1034_p5 = scmp.ne.s32.totalorder %s1029_s26, 0 }
  0x49   : > { %s942_s16 = sand.u32 (!%p1034_p5), 1, %s758_s19   ;;  %p1035_p0 = scmp.ne.s32.totalorder (!%p1034_p5), %s1027_s24, 0 }
  0x4a   : > { %218 = sbr.rel (%p1034_p5) target bundleno = 535 (0x217), region = 40  ;;  %s486_s17 = sshll.u32 (!%p1034_p5), %s942_s16, 3 }
  0x4b   : > { %s221_s23 = scalar_lea.sflag (!%p1034_p5), [#allocation3], %s942_s16  ;;  %s948_s27 = scalar_lea.vmem (!%p1034_p5), [#allocation2], %s486_s17 }
  0x51   : > { %741 = dma.done.wait (%p1035_p0), %s221_s23, 128  }
  0x52   : > { %743 = vsyncadd (%p1035_p0), %s221_s23, 4294967168  ;;  %p1036_p11 = scmp.eq.s32.totalorder %s827_s22, 0 }
  0x54   : > { %745 = dma.done.wait (%p1036_p11), [#allocation6], 2048   ;;  %p1037_p1 = pmov %p1036_p11 }
  0x55   : > { %v772_v0 = vmov 0.0|0.0   ;;  %vm773_vm0 = vmmov 0   ;;  %v774_v1 = vmov 0.0   ;;  %v256_v2 = vld [vmem:[#allocation5] sm:$0xff]  ;;  %v257_v3 = vld [vmem:[#allocation5 + $0x8] sm:$0xff]  ;;  %v258_v4 = vld [vmem:[#allocation5 + $0x10] sm:$0xff] }
  0x56   : > { %747 = vsyncadd (%p1037_p1), [#allocation6], 4294965248  ;;  %548 = vmatprep.subr.bf16.mxu0 %v772_v0  ;;  %545 = vmatprep.mubr.msk.f32.mxu0 %vm773_vm0, %v774_v1  ;;  %v549_v5 = vpack.c.bf16 %v257_v3, %v256_v2  ;;  %v259_v6 = vld [vmem:[#allocation5 + $0x18] sm:$0xff]  ;;  %v260_v8 = vld [vmem:[#allocation5 + $0x20] sm:$0xff]  ;;  %s493_s11 = sshll.u32 %s827_s22, 7  ;;  %s254_s12 = scalar_lea.vmem [#allocation7], %s486_s17 }
  0x57   : > { %v552_v7 = vpack.c.bf16 %v259_v6, %v258_v4  ;;  %v261_v9 = vld [vmem:[#allocation5 + $0x28] sm:$0xff]  ;;  %v262_v11 = vld [vmem:[#allocation5 + $0x30] sm:$0xff]  ;;  %v263_v12 = vld [vmem:[#allocation5 + $0x38] sm:$0xff]  ;;  %s399_s10 = sshll.u32 %s254_s12, 4  ;;  %s974_s28 = scalar_lea.hbm %s1023_s5, %s493_s11  ;;  %s976_s10 = int_to_ptr.vmem [resolvable:$true] %s399_s10 }
  0x58   : > { %550 = vmatpush3.bf16.msra.mxu0 %v549_v5  ;;  %v555_v10 = vpack.c.bf16 %v261_v9, %v260_v8  ;;  %v558_v13 = vpack.c.bf16 %v263_v12, %v262_v11  ;;  %v264_v14 = vld [vmem:[#allocation5 + $0x40] sm:$0xff]  ;;  %v265_v15 = vld [vmem:[#allocation5 + $0x48] sm:$0xff]  ;;  %v266_v17 = vld [vmem:[#allocation5 + $0x50] sm:$0xff]  ;;  %s386_s23 = scalar_lea.sflag [#allocation4], %s942_s16  ;;  %s775_s22 = smov [#allocation7]  }
  0x59   : > { %551 = vmatprep.subr.bf16.mxu0 %v772_v0  ;;  %v561_v16 = vpack.c.bf16 %v265_v15, %v264_v14  ;;  %v267_v18 = vld [vmem:[#allocation5 + $0x58] sm:$0xff]  ;;  %v268_v20 = vld [vmem:[#allocation5 + $0x60] sm:$0xff]  ;;  %v269_v21 = vld [vmem:[#allocation5 + $0x68] sm:$0xff]  ;;  %s700_s17 = sshll.u32 %s775_s22, 4  ;;  %s701_s17 = int_to_ptr.vmem [resolvable:$false] %s700_s17 }
  0x5a   : > { %v564_v19 = vpack.c.bf16 %v267_v18, %v266_v17  ;;  %v567_v22 = vpack.c.bf16 %v269_v21, %v268_v20  ;;  %v270_v23 = vld [vmem:[#allocation5 + $0x70] sm:$0xff]  ;;  %v271_v24 = vld [vmem:[#allocation5 + $0x78] sm:$0xff]  ;;  %s702_s24 = scalar_lea.vmem %s701_s17, 256  ;;  %p703_p10 = scmp.lt.s32.totalorder %s976_s10, %s701_s17 }
  0x5b   : > { %v570_v25 = vpack.c.bf16 %v271_v24, %v270_v23  ;;  %v255_v26 = vld [vmem:[%s948_s27] sm:$0xff]  ;;  %s696_s27 = scalar_lea.vmem %s976_s10, 128 }
  0x5c   : > { %553 = vmatpush3.bf16.msra.mxu0 %v552_v7  ;;  %v489_v27 = vld [vmem:[%s1020_s2] ss:$0 sm:$0xff]  ;;  %p697_p4 = scmp.ne.s32.totalorder %s976_s10, %s696_s27  ;;  %p704_p13 = scmp.lt.s32.totalorder %s702_s24, %s696_s27 }
  0x5d   : > { %554 = vmatprep.subr.bf16.mxu0 %v772_v0  ;;  %v490_v47 = vld [vmem:[%s1021_s3] ss:$0 sm:$0xff] }
  0x5e   : > { %v491_v49 = vld [vmem:[%s1022_s4] ss:$0 sm:$0xff]  ;;  %p698_p6 = pnand %p697_p4, %p897_p12  ;;  %p705_p3 = por %p704_p13, %p703_p10 }
  0x60   : > { %556 = vmatpush3.bf16.msra.mxu0 %v555_v10  ;;  %p699_p8 = pneg %p698_p6 }
  0x61   : > { %557 = vmatprep.subr.bf16.mxu0 %v772_v0 }
  0x62   : > { %p706_p7 = pnand %p705_p3, %p699_p8 }
  0x64   : > { %559 = vmatpush3.bf16.msra.mxu0 %v558_v13 }
  0x65   : > { %560 = vmatprep.subr.bf16.mxu0 %v772_v0 }
  0x68   : > { %562 = vmatpush3.bf16.msra.mxu0 %v561_v16 }
  0x69   : > { %563 = vmatprep.subr.bf16.mxu0 %v772_v0 }
  0x6c   : > { %565 = vmatpush3.bf16.msra.mxu0 %v564_v19 }
  0x6d   : > { %566 = vmatprep.subr.bf16.mxu0 %v772_v0 }
  0x70   : > { %568 = vmatpush3.bf16.msra.mxu0 %v567_v22 }
  0x71   : > { %569 = vmatprep.subr.bf16.mxu0 %v772_v0 }
  0x74   : > { %571 = vmatpush3.bf16.msra.mxu0 %v570_v25 }
  0x77   : > { %546 = vmatmul.mubr.f32.vlgmr.msra.gmra.mrb[0].mxu0 %v255_v26 }
 0x14a   : > { %v345_v28 = vpop.f32.mrb[0].mxu0 }
 0x14b   : > { %v346_v29 = vadd.f32 %v489_v27, %v345_v28  ;;  %v547_v30 = vpop.f32.mrb[1].mxu0 }
 0x14d   : > { %v350_v31 = vmul.f32 0.70710677, %v346_v29  ;;  %v349_v33 = vmul.f32 0.5, %v346_v29 }
 0x14f   : > { %634 = verf.f32 %v350_v31 }
 0x159   : > { %v635_v32 = vpop.eup %634 }
 0x15a   : > { %v352_v34 = vadd.f32 1.0, %v635_v32 }
 0x15c   : > { %v353_v35 = vmul.f32 %v352_v34, %v349_v33 }
 0x15e   : > { %354 = vadd.xlane.f32.xlu0 %v353_v35  ;;  %v356_v36 = vmul.f32 %v353_v35, %v353_v35 }
 0x162   : > { %357 = vadd.xlane.f32.xlu0 %v356_v36 }
 0x1eb   : > { %v355_v37 = vpop.xlane.xlu0 %354 }
 0x1ec   : > { %v359_v38 = vmul.f32 0.03125, %v355_v37 }
 0x1ee   : > { %v361_v40 = vmul.f32 %v359_v38, %v359_v38  ;;  %v366_v45 = vsub.f32 %v353_v35, %v359_v38 }
 0x1ef   : > { %v358_v39 = vpop.xlane.xlu0 %357 }
 0x1f0   : > { %v360_v41 = vmul.f32 0.03125, %v358_v39 }
 0x1f2   : > { %v362_v42 = vsub.f32 %v360_v41, %v361_v40 }
 0x1f4   : > { %v363_v43 = vmax.f32 %v362_v42, 0.0 }
 0x1f6   : > { %v364_v44 = vadd.f32 1e-12, %v363_v43 }
 0x1f8   : > { %636 = vrsqrt.f32 %v364_v44 }
 0x202   : > { %v637_v46 = vpop.eup %636 }
 0x203   : > { %v367_v48 = vmul.f32 %v637_v46, %v366_v45 }
 0x205   : > { %v375_v50 = vmul.f32 %v490_v47, %v367_v48 }
 0x207   : > { %v383_v51 = vadd.f32 %v491_v49, %v375_v50 }
 0x209   : > { %384 = vst [vmem:[%s254_s12] sm:$0xff] %v383_v51 }
 0x20a   : > { %709 = shalt.err (!%p706_p7)
}
 0x20b   : > { %s710_s16 = scalar_lea.hbm %s974_s28, 128  ;;  %s714_s6 = scalar_lea.hbm %s1023_s5, 256 }
 0x20c   : > { %p711_p9 = scmp.ne.s32.totalorder %s974_s28, %s710_s16  ;;  %p715_p0 = scmp.lt.u32.totalorder %s974_s28, %s1023_s5 }
 0x20d   : > { %p716_p11 = scmp.lt.u32.totalorder %s714_s6, %s710_s16  ;;  %p718_p4 = scmp.lt.u32.totalorder %s710_s16, %s974_s28 }
 0x20e   : > { %p712_p2 = pnand %p711_p9, %p897_p12 }
 0x20f   : > { %p717_p1 = por %p716_p11, %p715_p0 }
 0x210   : > { %p713_p5 = pneg %p712_p2 }
 0x211   : > { %p719_p6 = por %p718_p4, %p717_p1 }
 0x213   : > { %p720_p8 = pnand %p719_p6, %p713_p5 }
 0x215   : > { %723 = shalt.err (!%p720_p8)
}
 0x216   : > { %578 = dma.vmem_to_hbm [thread:$0]  (%p897_p12), %s976_s10, 128, %s974_s28, %s386_s23  }
 0x217 PF: > { %s411_s11 = sand.u32 1, %s754_s18   ;;  %p1038_p10 = scmp.ne.s32.totalorder %s1028_s25, 0 }
 0x218   : > { %p1039_p13 = scmp.ge.s32.totalorder %s766_s21, 2  ;;  %s412_s12 = scalar_lea.sflag [#allocation4], %s411_s11 }
 0x21a   : > { %p589_p3 = pnand %p1039_p13, %p1038_p10 }
 0x21c   : > { %749 = dma.done.wait (!%p589_p3), %s412_s12, 128  }
 0x21d   : > { %751 = vsyncadd (!%p589_p3), %s412_s12, 4294967168  ;;  %p19_p7 = scmp.ge.s32.totalorder %s862_s30, 4   ;;  %s1040_s18 = smov %s758_s19 }
 0x21e   : > { %s1041_s19 = smov %s762_s20  ;;  %s1042_s20 = smov %s893_s8 }
 0x21f   : > { %s1043_s21 = smov %s862_s30  ;;  %21 = sbr.rel (!%p19_p7) target bundleno = 6 (0x6), region = 89 }
 0x226   :  { %417 = vsyncpa [#allocation3], 1 }
 0x227   :  { %419 = vsyncpa [#allocation3 + $0x1], 1 }
 0x228   :  { %420 = vsyncpa [#allocation6], 1 }
 0x229   :  { %421 = vsyncpa [#allocation4], 1 }
 0x22a   :  { %423 = vsyncpa [#allocation4 + $0x1], 1 }

</bundles_post_ra>
